<compile_context>
chip_gen: v6e
topology: v6e:2x2x1
jax: 0.10.0
libtpu: 0.0.40
codegen_flags: <defaults>
</compile_context>

<pallas_src>
import functools

import jax
import jax.numpy as jnp
from jax.experimental import pallas as pl
from jax.experimental.pallas import tpu as pltpu

_LANE = 128                        # lane width (last-dim tiling unit)
_NEG = -1e30                       # mask bias for padded action logits
_MAX_BATCH_TILE = 4096             # per-step overhead ~0.35us -> use big tiles
_VMEM_TARGET = 40 * 1024 * 1024    # working-set budget for auto tile selection
_VMEM_CAP = 56 * 1024 * 1024       # stay under v7x's 64 MiB physical VMEM


def _round_up(n, m):
    return ((n + m - 1) // m) * m


def _sublane(dtype):
    """Rows per vreg for this dtype: 8 (f32) / 16 (bf16) / 32 (int8/fp8)."""
    return max(8, 32 // jnp.dtype(dtype).itemsize)


def _vmem_bytes(tb, s, hp, ap, n_act, x_isz, w_isz):
    """VMEM working-set estimate for one grid step.

    Resident weight/bias specs are counted at 2x: BlockSpec inputs are
    double-buffered even with a constant index_map.
    """
    resident = 2 * (s * hp * w_isz + hp * ap * w_isz + (hp + ap) * 4)
    streamed = 2 * tb * s * x_isz + 2 * tb * n_act * 4      # dbl-buffered x / out
    working = tb * hp * 4 + 2 * tb * ap * 4                 # hidden + logits + exp
    return resident + streamed + working


def _policy_kernel(x_ref, w1_ref, b1_ref, w2_ref, b2_ref, out_ref):
    """One batch tile of softmax(relu(x @ W1 + b1) @ W2 + b2).

    MXU operands use the stored weight dtype (bf16 weights hit the native bf16
    path); accumulation and all elementwise math are f32.  The softmax runs on
    the lane-padded (tb, ap) logits; only the real n_actions columns are
    stored to HBM.
    """
    x = x_ref[...].astype(w1_ref.dtype)                            # (TB, S)
    h = jnp.dot(x, w1_ref[...], preferred_element_type=jnp.float32)
    h = jnp.maximum(h + b1_ref[...], 0.0)                          # f32 bias + ReLU

    logits = jnp.dot(h.astype(w2_ref.dtype), w2_ref[...],
                     preferred_element_type=jnp.float32) + b2_ref[...]

    # Numerically stable softmax over the lane-padded action axis; padded lanes
    # carry a -1e30 bias so exp() underflows them to exactly 0.
    m = jnp.max(logits, axis=-1, keepdims=True)
    e = jnp.exp(logits - m)
    denom = jnp.sum(e, axis=-1, keepdims=True)
    r = pl.reciprocal(denom, approx=True)          # EUP vrcp (own VLIW slot)
    r = r * (2.0 - denom * r)                      # Newton step -> full f32 accuracy
    probs = e * r

    n_act = out_ref.shape[-1]                      # static
    out_ref[...] = probs[:, :n_act].astype(out_ref.dtype)


def pad_policy_params(w1, b1, w2, b2):
    """Pad weights/biases to lane-dense shapes ONCE (call at init, not per step).

    Returns (w1p, b1p, w2p, b2p, n_actions).  Padding is numerically exact:
    padded hidden units are 0 after ReLU and hit zero rows of W2; padded action
    logits get a -1e30 bias so softmax assigns them probability 0.
    """
    state_dim, hidden = w1.shape
    n_actions = w2.shape[1]
    hp = _round_up(hidden, _LANE)
    ap = _round_up(n_actions, _LANE)
    w1p = jnp.zeros((state_dim, hp), w1.dtype).at[:, :hidden].set(w1)
    b1p = jnp.zeros((1, hp), jnp.float32).at[:, :hidden].set(
        b1.astype(jnp.float32).reshape(1, hidden))
    w2p = jnp.zeros((hp, ap), w2.dtype).at[:hidden, :n_actions].set(w2)
    b2p = jnp.full((1, ap), _NEG, jnp.float32).at[:, :n_actions].set(
        b2.astype(jnp.float32).reshape(1, n_actions))
    return w1p, b1p, w2p, b2p, n_actions


@functools.partial(jax.jit, static_argnames=("n_actions", "batch_tile"))
def policy_forward(x, w1p, b1p, w2p, b2p, *, n_actions, batch_tile=None):
    """Fused MLP + softmax forward pass.

    x: (state_dim,) or (batch, state_dim); weights are the *padded* params
    from `pad_policy_params` (f32 or bf16).  Returns f32 probabilities of
    shape (batch, n_actions).
    """
    if x.ndim == 1:
        x = x[None, :]
    batch, state_dim = x.shape
    hp = w1p.shape[1]
    ap = w2p.shape[1]

    sub = _sublane(x.dtype)
    x_isz = x.dtype.itemsize
    w_isz = w1p.dtype.itemsize

    # ---- Batch tile selection -------------------------------------------
    if batch_tile is None:
        tb = min(_MAX_BATCH_TILE, _round_up(batch, sub))
        while tb > sub and _vmem_bytes(tb, state_dim, hp, ap, n_actions,
                                       x_isz, w_isz) > _VMEM_TARGET:
            tb = max(sub, tb // 2)
        # Force >=2 grid steps for non-trivial batches so the "parallel" axis
        # can shard across v7x's two TensorCores (weights stay resident).
        if pl.cdiv(batch, tb) == 1 and batch >= 2 * sub:
            tb = max(sub, _round_up(pl.cdiv(batch, 2), sub))
    else:
        tb = max(sub, _round_up(int(batch_tile), sub))
    grid = (pl.cdiv(batch, tb),)

    budget = _vmem_bytes(tb, state_dim, hp, ap, n_actions, x_isz, w_isz)
    vmem_limit = int(min(_VMEM_CAP, max(32 * 1024 * 1024, budget + (8 << 20))))

    cost = pl.CostEstimate(
        flops=2 * batch * (state_dim * hp + hp * ap),
        transcendentals=batch * (ap + 1),
        bytes_accessed=(batch * state_dim * x_isz
                        + (state_dim * hp + hp * ap) * w_isz
                        + (hp + ap) * 4
                        + batch * n_actions * 4),
    )

    # TODO(synk): for very large hidden sizes (hp >~ 2048 bf16) add a K-tiling
    # grid axis ("arbitrary") over hp with a VMEM f32 accumulator so the
    # resident W1/W2 fit v7x's 64 MiB VMEM; not needed at policy-MLP scale.
    out = pl.pallas_call(
        _policy_kernel,
        out_shape=jax.ShapeDtypeStruct((batch, n_actions), jnp.float32),
        grid_spec=pltpu.PrefetchScalarGridSpec(
            num_scalar_prefetch=0,
            grid=grid,
            in_specs=[
                pl.BlockSpec((tb, state_dim), lambda i: (i, 0)),   # streamed x
                pl.BlockSpec((state_dim, hp), lambda i: (0, 0)),   # resident W1
                pl.BlockSpec((1, hp), lambda i: (0, 0)),           # resident b1
                pl.BlockSpec((hp, ap), lambda i: (0, 0)),          # resident W2
                pl.BlockSpec((1, ap), lambda i: (0, 0)),           # resident b2
            ],
            out_specs=pl.BlockSpec((tb, n_actions), lambda i: (i, 0)),
        ),
        compiler_params=pltpu.CompilerParams(
            dimension_semantics=("parallel",),       # independent batch tiles
            vmem_limit_bytes=vmem_limit),
        cost_estimate=cost,
    )(x, w1p, b1p, w2p, b2p)

    return out


def init_policy_params(key, state_dim, hidden_size, n_actions):
    """PyTorch-Linear-style uniform init; weights stored (in, out)."""
    k1, k2, k3, k4 = jax.random.split(key, 4)
    lim1 = 1.0 / jnp.sqrt(jnp.float32(state_dim))
    lim2 = 1.0 / jnp.sqrt(jnp.float32(hidden_size))
    w1 = jax.random.uniform(k1, (state_dim, hidden_size), jnp.float32, -lim1, lim1)
    b1 = jax.random.uniform(k2, (1, hidden_size), jnp.float32, -lim1, lim1)
    w2 = jax.random.uniform(k3, (hidden_size, n_actions), jnp.float32, -lim2, lim2)
    b2 = jax.random.uniform(k4, (1, n_actions), jnp.float32, -lim2, lim2)
    return w1, b1, w2, b2


if __name__ == "__main__":
    key = jax.random.PRNGKey(0)
    kx, kp, kx2, kx3 = jax.random.split(key, 4)

    # CartPole-like config, spec default hidden_size=128, n_actions=2.
    state_dim, hidden_size, n_actions = 4, 128, 2
    w1, b1, w2, b2 = init_policy_params(kp, state_dim, hidden_size, n_actions)

    def reference(x, w1, b1, w2, b2):
        f = lambda a: a.astype(jnp.float32)
        h = jnp.maximum(f(x) @ f(w1) + f(b1), 0.0)
        return jax.nn.softmax(h @ f(w2) + f(b2), axis=-1)

    # Pad params ONCE (hoisted out of the forward path).
    w1p, b1p, w2p, b2p, na = pad_policy_params(w1, b1, w2, b2)
    jax.block_until_ready((w1p, b1p, w2p, b2p))

    # --- Test 1: tiny f32 batch (per-env-step inference shape) ---------------
    x_small = jax.random.normal(kx, (2, state_dim), jnp.float32)
    probs = policy_forward(x_small, w1p, b1p, w2p, b2p, n_actions=na)
    jax.block_until_ready(probs)
    assert probs.shape == (2, n_actions)
    assert jnp.allclose(probs, reference(x_small, w1, b1, w2, b2),
                        atol=1e-4, rtol=1e-4)
    assert jnp.allclose(jnp.sum(probs, axis=-1), 1.0, atol=1e-4)

    # --- Test 2: batched rollout, bf16 weights, explicit multi-tile grid -----
    x_big = jax.random.normal(kx2, (300, state_dim), jnp.float32).astype(jnp.bfloat16)
    w1b, w2b = w1.astype(jnp.bfloat16), w2.astype(jnp.bfloat16)
    w1pb, b1pb, w2pb, b2pb, nab = pad_policy_params(w1b, b1, w2b, b2)
    probs_b = policy_forward(x_big, w1pb, b1pb, w2pb, b2pb,
                             n_actions=nab, batch_tile=128)
    jax.block_until_ready(probs_b)
    assert probs_b.shape == (300, n_actions)
    assert jnp.allclose(probs_b, reference(x_big, w1b, b1, w2b, b2), atol=2e-2)
    assert jnp.allclose(jnp.sum(probs_b, axis=-1), 1.0, atol=1e-3)

    # --- Test 3: auto tile selection (>=2 grid steps for megacore) -----------
    x_mid = jax.random.normal(kx3, (600, state_dim), jnp.float32)
    probs_m = policy_forward(x_mid, w1p, b1p, w2p, b2p, n_actions=na)
    jax.block_until_ready(probs_m)
    assert probs_m.shape == (600, n_actions)
    assert jnp.allclose(probs_m, reference(x_mid, w1, b1, w2, b2),
                        atol=1e-4, rtol=1e-4)

    # --- 1-D single-state input path ------------------------------------------
    p1 = policy_forward(x_small[0], w1p, b1p, w2p, b2p, n_actions=na)
    jax.block_until_ready(p1)
    assert p1.shape == (1, n_actions)

    print("KERNEL_OK")
</pallas_src>

<mosaic_0001>
module attributes {stable_mosaic.version = 11 : i64} {
  func.func @_policy_kernel(%arg0: i32, %arg1: memref<8x4xf32, #tpu.memory_space<vmem>>, %arg2: memref<4x128xf32, #tpu.memory_space<vmem>>, %arg3: memref<1x128xf32, #tpu.memory_space<vmem>>, %arg4: memref<128x128xf32, #tpu.memory_space<vmem>>, %arg5: memref<1x128xf32, #tpu.memory_space<vmem>>, %arg6: memref<8x2xf32, #tpu.memory_space<vmem>>) attributes {dimension_semantics = [#tpu.dimension_semantics<parallel>], iteration_bounds = array<i64: 1>, scalar_prefetch = 0 : i64, scratch_operands = 0 : i64, tpu.core_type = #tpu.core_type<tc>, window_params = [{transform_indices = @transform_0, window_bounds = array<i64: 8, 4>}, {pipeline_mode = #tpu.pipeline_mode<synchronous>, transform_indices = @transform_1, window_bounds = array<i64: 4, 128>}, {pipeline_mode = #tpu.pipeline_mode<synchronous>, transform_indices = @transform_2, window_bounds = array<i64: 1, 128>}, {pipeline_mode = #tpu.pipeline_mode<synchronous>, transform_indices = @transform_3, window_bounds = array<i64: 128, 128>}, {pipeline_mode = #tpu.pipeline_mode<synchronous>, transform_indices = @transform_4, window_bounds = array<i64: 1, 128>}, {transform_indices = @transform_5, window_bounds = array<i64: 8, 2>}]} {
    %c0 = arith.constant 0 : index
    %c0_0 = arith.constant 0 : index
    %0 = vector.load %arg1[%c0, %c0_0] : memref<8x4xf32, #tpu.memory_space<vmem>>, vector<8x4xf32>
    %c0_1 = arith.constant 0 : index
    %c0_2 = arith.constant 0 : index
    %1 = vector.load %arg2[%c0_1, %c0_2] : memref<4x128xf32, #tpu.memory_space<vmem>>, vector<4x128xf32>
    %cst = arith.constant dense<0.000000e+00> : vector<8x128xf32>
    %2 = tpu.matmul %0, %1, %cst {dimension_numbers = #tpu.dot_dimension_numbers<[1], [0], [0], [1], [0, 0, 1, 1], [], []>} : vector<8x4xf32>, vector<4x128xf32>, vector<8x128xf32> -> vector<8x128xf32>
    %c0_3 = arith.constant 0 : index
    %c0_4 = arith.constant 0 : index
    %3 = vector.load %arg3[%c0_3, %c0_4] : memref<1x128xf32, #tpu.memory_space<vmem>>, vector<1x128xf32>
    %4 = vector.broadcast %3 : vector<1x128xf32> to vector<8x128xf32>
    %5 = arith.addf %2, %4 : vector<8x128xf32>
    %cst_5 = arith.constant 0.000000e+00 : f32
    %6 = vector.broadcast %cst_5 : f32 to vector<8x128xf32>
    %7 = arith.maximumf %5, %6 : vector<8x128xf32>
    %c0_6 = arith.constant 0 : index
    %c0_7 = arith.constant 0 : index
    %8 = vector.load %arg4[%c0_6, %c0_7] : memref<128x128xf32, #tpu.memory_space<vmem>>, vector<128x128xf32>
    %cst_8 = arith.constant dense<0.000000e+00> : vector<8x128xf32>
    %9 = tpu.matmul %7, %8, %cst_8 {dimension_numbers = #tpu.dot_dimension_numbers<[1], [0], [0], [1], [0, 0, 1, 1], [], []>} : vector<8x128xf32>, vector<128x128xf32>, vector<8x128xf32> -> vector<8x128xf32>
    %c0_9 = arith.constant 0 : index
    %c0_10 = arith.constant 0 : index
    %10 = vector.load %arg5[%c0_9, %c0_10] : memref<1x128xf32, #tpu.memory_space<vmem>>, vector<1x128xf32>
    %11 = vector.broadcast %10 : vector<1x128xf32> to vector<8x128xf32>
    %12 = arith.addf %9, %11 : vector<8x128xf32>
    %cst_11 = arith.constant dense<0xFF800000> : vector<8xf32>
    %13 = vector.multi_reduction <maximumf>, %12, %cst_11 [1] : vector<8x128xf32> to vector<8xf32>
    %14 = vector.shape_cast %13 : vector<8xf32> to vector<8x1xf32>
    %15 = vector.broadcast %14 : vector<8x1xf32> to vector<8x128xf32>
    %16 = arith.subf %12, %15 : vector<8x128xf32>
    %17 = math.exp %16 : vector<8x128xf32>
    %cst_12 = arith.constant dense<0.000000e+00> : vector<8xf32>
    %18 = vector.multi_reduction <add>, %17, %cst_12 [1] : vector<8x128xf32> to vector<8xf32>
    %19 = vector.shape_cast %18 : vector<8xf32> to vector<8x1xf32>
    %20 = tpu.reciprocal %19 {approx = true} : vector<8x1xf32> -> vector<8x1xf32>
    %21 = arith.mulf %19, %20 : vector<8x1xf32>
    %cst_13 = arith.constant 2.000000e+00 : f32
    %22 = vector.broadcast %cst_13 : f32 to vector<8x1xf32>
    %23 = arith.subf %22, %21 : vector<8x1xf32>
    %24 = arith.mulf %20, %23 : vector<8x1xf32>
    %25 = vector.broadcast %24 : vector<8x1xf32> to vector<8x128xf32>
    %26 = arith.mulf %17, %25 : vector<8x128xf32>
    %27 = vector.extract_strided_slice %26 {offsets = [0, 0], sizes = [8, 2], strides = [1, 1]} : vector<8x128xf32> to vector<8x2xf32>
    %c0_14 = arith.constant 0 : index
    %c0_15 = arith.constant 0 : index
    %28 = vector.load %arg6[%c0_14, %c0_15] : memref<8x2xf32, #tpu.memory_space<vmem>>, vector<8x2xf32>
    tpu.vector_store %arg6[%c0_14, %c0_15], %27 {strides = array<i32>} : memref<8x2xf32, #tpu.memory_space<vmem>>, vector<8x2xf32>,
    return
  }
  func.func @transform_0(%arg0: i32) -> (i32, i32) {
    %c0_i32 = arith.constant 0 : i32
    %c0_i32_0 = arith.constant 0 : i32
    return %arg0, %c0_i32 : i32, i32
  }
  func.func @transform_1(%arg0: i32) -> (i32, i32) {
    %c0_i32 = arith.constant 0 : i32
    %c0_i32_0 = arith.constant 0 : i32
    %c0_i32_1 = arith.constant 0 : i32
    return %c0_i32, %c0_i32_0 : i32, i32
  }
  func.func @transform_2(%arg0: i32) -> (i32, i32) {
    %c0_i32 = arith.constant 0 : i32
    %c0_i32_0 = arith.constant 0 : i32
    %c0_i32_1 = arith.constant 0 : i32
    return %c0_i32, %c0_i32_0 : i32, i32
  }
  func.func @transform_3(%arg0: i32) -> (i32, i32) {
    %c0_i32 = arith.constant 0 : i32
    %c0_i32_0 = arith.constant 0 : i32
    %c0_i32_1 = arith.constant 0 : i32
    return %c0_i32, %c0_i32_0 : i32, i32
  }
  func.func @transform_4(%arg0: i32) -> (i32, i32) {
    %c0_i32 = arith.constant 0 : i32
    %c0_i32_0 = arith.constant 0 : i32
    %c0_i32_1 = arith.constant 0 : i32
    return %c0_i32, %c0_i32_0 : i32, i32
  }
  func.func @transform_5(%arg0: i32) -> (i32, i32) {
    %c0_i32 = arith.constant 0 : i32
    %c0_i32_0 = arith.constant 0 : i32
    return %arg0, %c0_i32 : i32, i32
  }
}

</mosaic_0001>

<bundles_post_ra>
// kernel: policy_forward.1
= control target key start
LH: loop header
LB: loop body
LE: loop exit
PB: predicated region body
PF: predicated region fallthrough
CT: control target
= control target key end

     0   :  { %10 = vsyncpa [#allocation3], 0  ;;  %s500_s0 = inlined_call_operand.hbm [shape: f32[2,4], index: 0, kind: input, shape index: {}]   ;;  %s501_s1 = inlined_call_operand.hbm [shape: f32[4,128], index: 1, kind: input, shape index: {}]   ;;  %s502_s2 = inlined_call_operand.vmem [shape: f32[1,128], index: 2, kind: input, shape index: {}]   ;;  %s503_s3 = inlined_call_operand.hbm [shape: f32[128,128], index: 3, kind: input, shape index: {}]   ;;  %s504_s4 = inlined_call_operand.vmem [shape: f32[1,128], index: 4, kind: input, shape index: {}]   ;;  %s505_s5 = inlined_call_operand.hbm [shape: f32[2,2], index: 5, kind: output, shape index: {}]  }
   0x1   :  { %11 = vsyncpa [#allocation6], 0 }
   0x2   :  { %12 = vsyncpa [#allocation4], 0 }
   0x3   :  { %17 = vsyncadd [#allocation3], 96  ;;  %s436_s18 = smov [#allocation5]   ;;  %s437_s20 = smov [#allocation2]  }
   0x4   :  { %s31_s19 = sshll.u32 %s436_s18, 4  ;;  %s18_s21 = sshll.u32 %s437_s20, 4  ;;  %s32_s19 = int_to_ptr.vmem [resolvable:$true] %s31_s19  ;;  %s19_s21 = int_to_ptr.vmem [resolvable:$true] %s18_s21 }
   0x5   :  { %s358_s22 = scalar_lea.vmem %s32_s19, 64  ;;  %p363_p1 = scmp.lt.s32.totalorder %s32_s19, %s32_s19 }
   0x6   :  { %p359_p0 = scmp.ne.s32.totalorder %s32_s19, %s358_s22  ;;  %p364_p2 = scmp.lt.s32.totalorder %s358_s22, %s358_s22 }
   0x8   :  { %p365_p3 = por %p364_p2, %p363_p1 }
   0xa   :  { %p366_p4 = pnand %p365_p3, %p359_p0 }
   0xc   :  { %369 = shalt.err (!%p366_p4)
}
   0xd   :  { %34 = dma.hbm_to_vmem [thread:$0]  %s501_s1, 64, %s32_s19, [#allocation6]  }
   0xe   :  { %s378_s25 = scalar_lea.vmem %s19_s21, 32  ;;  %s382_s26 = scalar_lea.vmem %s19_s21, 128 }
   0xf   :  { %p379_p5 = scmp.ne.s32.totalorder %s19_s21, %s378_s25  ;;  %p383_p6 = scmp.lt.s32.totalorder %s19_s21, %s19_s21 }
  0x10   :  { %p384_p7 = scmp.lt.s32.totalorder %s382_s26, %s378_s25 }
  0x12   :  { %p385_p8 = por %p384_p7, %p383_p6 }
  0x14   :  { %p386_p9 = pnand %p385_p8, %p379_p5 }
  0x16   :  { %389 = shalt.err (!%p386_p9)
}
  0x17   :  { %s438_s27 = smov 32   ;;  %s439_s28 = smov 2  }
  0x18   :  { %24 = dma.hbm_to_vmem [thread:$0]  %s500_s0, 32, %s19_s21, [#allocation3], %s438_s27, %s438_s27, %s439_s28  }
  0x19   :  { %s440_s6 = smov [#allocation7]  }
  0x1a   :  { %s42_s7 = sshll.u32 %s440_s6, 4  ;;  %s43_s7 = int_to_ptr.vmem [resolvable:$true] %s42_s7 }
  0x1b   :  { %s398_s1 = scalar_lea.vmem %s43_s7, 2048  ;;  %p403_p11 = scmp.lt.s32.totalorder %s43_s7, %s43_s7 }
  0x1c   :  { %p399_p10 = scmp.ne.s32.totalorder %s43_s7, %s398_s1  ;;  %p404_p12 = scmp.lt.s32.totalorder %s398_s1, %s398_s1 }
  0x1e   :  { %p405_p13 = por %p404_p12, %p403_p11 }
  0x20   :  { %p406_p0 = pnand %p405_p13, %p399_p10 }
  0x22   :  { %409 = shalt.err (!%p406_p0)
}
  0x23   :  { %s441_s8 = smov 128   ;;  %s442_s9 = smov 8  }
  0x24   :  { %48 = dma.hbm_to_vmem [thread:$0]  %s503_s3, 2048, %s43_s7, [#allocation6], %s441_s8, %s441_s8, %s442_s9  }
  0x25   :  { %430 = dma.done.wait [#allocation3], 128  }
  0x26   :  { %431 = vsyncadd [#allocation3], 4294967168 }
  0x27   :  { %432 = dma.done.wait [#allocation6], 2112  }
  0x28   :  { %433 = vsyncadd [#allocation6], 4294965184  ;;  %v443_v0 = vmov 0.0   ;;  %vm444_vm0 = vmmov 0   ;;  %vm73_vm1 = vcmask 1043456   ;;  %vm69_vm2 = vcmask 31744  }
  0x29   :  { %296 = vmatprep.subr.mxu0 %v443_v0  ;;  %298 = vmatprep.mubr.msk.f32.mxu0 %vm444_vm0, %v443_v0  ;;  %v61_v1 = vld [vmem:[#allocation5] sm:$0xf]  ;;  %v60_v2 = vld [vmem:[#allocation2] sm:$0xff]  ;;  %v161_v5 = vld [vmem:[#allocation7 + $0x68] sm:$0xff]  ;;  %vm253_vm3 = vcmask 15360  }
  0x2a   :  { %301 = vmatprep.subr.mxu1 %v443_v0  ;;  %333 = vmatprep.mubr.msk.f32.mxu1 %vm444_vm0, %v443_v0  ;;  %v163_v3 = vld [vmem:[#allocation7 + $0x78] sm:$0xff]  ;;  %v162_v4 = vld [vmem:[#allocation7 + $0x70] sm:$0xff]  ;;  %v160_v6 = vld [vmem:[#allocation7 + $0x60] sm:$0xff] }
  0x2b   :  { %297 = vmatpush3.msk.msra.mxu0 %vm73_vm1, %v61_v1  ;;  %302 = vmatpush3.msra.mxu1 %v163_v3  ;;  %v159_v7 = vld [vmem:[#allocation7 + $0x58] sm:$0xff]  ;;  %v158_v8 = vld [vmem:[#allocation7 + $0x50] sm:$0xff]  ;;  %v157_v9 = vld [vmem:[#allocation7 + $0x48] sm:$0xff] }
  0x2c   :  { %299 = vmatmul.mubr.msk.f32.vlgmr.msra.gmra.mxu0 %vm69_vm2, %v60_v2  ;;  %303 = vmatprep.subr.mxu1 %v443_v0  ;;  %v156_v10 = vld [vmem:[#allocation7 + $0x40] sm:$0xff]  ;;  %v155_v11 = vld [vmem:[#allocation7 + $0x38] sm:$0xff]  ;;  %v154_v12 = vld [vmem:[#allocation7 + $0x30] sm:$0xff] }
  0x2d   :  { %304 = vmatpush3.msra.mxu1 %v162_v4  ;;  %v153_v13 = vld [vmem:[#allocation7 + $0x28] sm:$0xff]  ;;  %v152_v14 = vld [vmem:[#allocation7 + $0x20] sm:$0xff]  ;;  %v151_v15 = vld [vmem:[#allocation7 + $0x18] sm:$0xff] }
  0x2e   :  { %305 = vmatprep.subr.mxu1 %v443_v0  ;;  %v150_v16 = vld [vmem:[#allocation7 + $0x10] sm:$0xff]  ;;  %v149_v17 = vld [vmem:[#allocation7 + $0x8] sm:$0xff]  ;;  %v148_v18 = vld [vmem:[#allocation7] sm:$0xff] }
  0x2f   :  { %306 = vmatpush3.msra.mxu1 %v161_v5  ;;  %v273_v19 = vld [vmem:[%s502_s2] ss:$0 sm:$0xff] }
  0x30   :  { %307 = vmatprep.subr.mxu1 %v443_v0  ;;  %v276_v24 = vld [vmem:[%s504_s4] ss:$0 sm:$0xff] }
  0x31   :  { %308 = vmatpush3.msra.mxu1 %v160_v6 }
  0x32   :  { %309 = vmatprep.subr.mxu1 %v443_v0 }
  0x33   :  { %310 = vmatpush3.msra.mxu1 %v159_v7 }
  0x34   :  { %311 = vmatprep.subr.mxu1 %v443_v0 }
  0x35   :  { %312 = vmatpush3.msra.mxu1 %v158_v8 }
  0x36   :  { %313 = vmatprep.subr.mxu1 %v443_v0 }
  0x37   :  { %314 = vmatpush3.msra.mxu1 %v157_v9 }
  0x38   :  { %315 = vmatprep.subr.mxu1 %v443_v0 }
  0x39   :  { %316 = vmatpush3.msra.mxu1 %v156_v10 }
  0x3a   :  { %317 = vmatprep.subr.mxu1 %v443_v0 }
  0x3b   :  { %318 = vmatpush3.msra.mxu1 %v155_v11 }
  0x3c   :  { %319 = vmatprep.subr.mxu1 %v443_v0 }
  0x3d   :  { %320 = vmatpush3.msra.mxu1 %v154_v12 }
  0x3e   :  { %321 = vmatprep.subr.mxu1 %v443_v0 }
  0x3f   :  { %322 = vmatpush3.msra.mxu1 %v153_v13 }
  0x40   :  { %323 = vmatprep.subr.mxu1 %v443_v0 }
  0x41   :  { %324 = vmatpush3.msra.mxu1 %v152_v14 }
  0x42   :  { %325 = vmatprep.subr.mxu1 %v443_v0 }
  0x43   :  { %326 = vmatpush3.msra.mxu1 %v151_v15 }
  0x44   :  { %327 = vmatprep.subr.mxu1 %v443_v0 }
  0x45   :  { %328 = vmatpush3.msra.mxu1 %v150_v16 }
  0x46   :  { %329 = vmatprep.subr.mxu1 %v443_v0 }
  0x47   :  { %330 = vmatpush3.msra.mxu1 %v149_v17 }
  0x48   :  { %331 = vmatprep.subr.mxu1 %v443_v0 }
  0x49   :  { %332 = vmatpush3.msra.mxu1 %v148_v18 }
  0xec   :  { %v143_v20 = vpop.f32.mrf.mxu0 }
  0xed   :  { %v144_v21 = vadd.f32 %v273_v19, %v143_v20 }
  0xee   :  { %v300_v22 = vpop.f32.mrf.mxu0 }
  0xef   :  { %v147_v23 = vmax.f32 %v144_v21, 0.0 }
  0xf1   :  { %334 = vmatmul.mubr.f32.vlgmr.msra.gmra.mxu1 %v147_v23 }
 0x1b1   :  { %v237_v25 = vpop.f32.mrf.mxu1 }
 0x1b2   :  { %v238_v26 = vadd.f32 %v276_v24, %v237_v25 }
 0x1b3   :  { %v335_v27 = vpop.f32.mrf.mxu1 }
 0x1b4   :  { %241 = vmax.xlane.f32.xlu0 %v238_v26 }
 0x23d   :  { %v242_v28 = vpop.xlane.xlu0 %241 }
 0x23e   :  { %v243_v29 = vsub.f32 %v238_v26, %v242_v28 }
 0x240   :  { %v244_v30 = vmul.f32 1.442695, %v243_v29 }
 0x242   :  { %346 = vpow2.f32 %v244_v30 }
 0x24f   :  { %v347_v31 = vpop.eup %346 }
 0x250   :  { %246 = vadd.xlane.f32.xlu0 %v347_v31 }
 0x2d9   :  { %v247_v32 = vpop.xlane.xlu0 %246 }
 0x2da   :  { %348 = vrcp.f32 %v247_v32 }
 0x2e7   :  { %v349_v33 = vpop.eup %348 }
 0x2e8   :  { %v249_v34 = vmul.f32 %v349_v33, %v247_v32 }
 0x2ea   :  { %v250_v35 = vsub.f32 2.0, %v249_v34 }
 0x2ec   :  { %v251_v36 = vmul.f32 %v349_v33, %v250_v35 }
 0x2ee   :  { %v252_v37 = vmul.f32 %v347_v31, %v251_v36 }
 0x2f0   :  { %254 = vst.msk [vmem:[#allocation8] sm:$0xff] %vm253_vm3, %v252_v37 }
 0x2f1   :  { %259 = vsyncadd [#allocation4], 96  ;;  %s445_s2 = smov [#allocation8]  }
 0x2f2   :  { %s260_s4 = sshll.u32 %s445_s2, 4  ;;  %s261_s4 = int_to_ptr.vmem [resolvable:$true] %s260_s4 }
 0x2f3   :  { %s410_s14 = scalar_lea.vmem %s261_s4, 32  ;;  %s414_s15 = scalar_lea.vmem %s261_s4, 128 }
 0x2f4   :  { %p411_p1 = scmp.ne.s32.totalorder %s261_s4, %s410_s14  ;;  %p415_p2 = scmp.lt.s32.totalorder %s261_s4, %s261_s4 }
 0x2f5   :  { %p416_p3 = scmp.lt.s32.totalorder %s414_s15, %s410_s14 }
 0x2f7   :  { %p417_p4 = por %p416_p3, %p415_p2 }
 0x2f9   :  { %p418_p5 = pnand %p417_p4, %p411_p1 }
 0x2fb   :  { %421 = shalt.err (!%p418_p5)
}
 0x2fc   :  { %266 = dma.vmem_to_hbm [thread:$0]  %s261_s4, 32, %s505_s5, [#allocation4], %s438_s27, %s438_s27, %s439_s28  }
 0x2fd   :  { %434 = dma.done.wait [#allocation4], 128  }
 0x2fe   :  { %435 = vsyncadd [#allocation4], 4294967168 }
 0x2ff   :  { %270 = vsyncpa [#allocation3], 1 }
 0x300   :  { %271 = vsyncpa [#allocation6], 1 }
 0x301   :  { %272 = vsyncpa [#allocation4], 1 }

</bundles_post_ra>
